<compile_context>
chip_gen: v5e
topology: v5e:2x2
jax: 0.10.0
libtpu: 0.0.40
codegen_flags: <defaults>
</compile_context>

<pallas_src>
import functools

import numpy as np
import jax
import jax.numpy as jnp
from jax import lax
from jax.experimental import pallas as pl
from jax.experimental.pallas import tpu as pltpu

EPS = 1e-6
NEG_SLOPE = 0.2          # LeakyReLU negative slope used in the module
LANE = 128               # pad all channel dims to a multiple of the vreg lane width
SUBLANE = 8              # f32 sublane height


def _leaky(x, slope):
    return jnp.where(x >= 0, x, slope * x)


def _round_up(x, m):
    return ((x + m - 1) // m) * m


# ----------------------------------------------------------------------------- #
# One grid step = one layer on one batch tile.
#
# Per layer (hybrid vector-neuron, SO(3) mode — see TODO above):
#   eq  = v @ [Wv | Wv2s | Wdir]              (one MXU push, all 9 products)
#   sc  = s @ [Ws2v | Ws2s] + [bs2v | bs2s]   (one MXU push, both scalar maps)
#   v'  = (v @ Wv) * gate,   gate = s@Ws2v + bs2v
#   s'  = <v@Wv2s, channel_equi_vec_normalize(v@Wdir)> + s@Ws2s + bs2s
#   act: VN-LeakyReLU on v' (learned direction v'@Wact), plain LeakyReLU on s'
#   skip (per-layer flag from SMEM): v <- v' + v,  s <- s' + s
#   head (last grid step): no activation / no skip, lane-dense store.
# ----------------------------------------------------------------------------- #
def _ldm_layer_kernel(skip_ref, v0_ref, s0_ref, wvec_ref, wscal_ref, bscal_ref,
                      wact_ref, vo_ref, so_ref, v_sc, s_sc, *, P, bt,
                      neg_slope, eps):
    f32 = jnp.float32
    bf16 = jnp.bfloat16
    l = pl.program_id(1)
    n_layers = pl.num_programs(1)

    @pl.when(l == 0)
    def _():                                   # (re)load activations per batch tile
        v_sc[...] = v0_ref[...]
        s_sc[...] = s0_ref[...]

    v = v_sc[...]                              # (3, bt, P) f32
    s = s_sc[...]                              # (bt, P)    f32

    # --- fused equivariant matmul: (3bt, P) @ (P, 3P) = [Wv | Wv2s | Wdir] ----
    eq = jnp.dot(v.reshape(3 * bt, P).astype(bf16), wvec_ref[0],
                 preferred_element_type=f32).reshape(3, bt, 3 * P)
    # --- fused scalar matmul: (bt, P) @ (P, 2P) = [Ws2v | Ws2s] + bias --------
    sc = jnp.dot(s.astype(bf16), wscal_ref[0],
                 preferred_element_type=f32) + bscal_ref[0]

    gate = sc[:, :P]                           # (bt, P) invariant per-channel gate
    s_lin = sc[:, P:]                          # (bt, P) scalar->scalar branch

    n = eq[:, :, :P] * gate[None]              # (3, bt, P) gated equivariant feats
    pv = eq[:, :, P:2 * P]                     # (3, bt, P) vector->scalar proj.
    dv = eq[:, :, 2 * P:]                      # (3, bt, P) learned directions

    # --- invariant projection onto channel-normalized directions -------------
    dsq = jnp.sum(dv * dv, axis=0)                                   # (bt, P)
    dnorm = jnp.sqrt(dsq)
    chn = jnp.sqrt(jnp.sum(dsq, axis=1, keepdims=True))              # (bt, 1)
    scale = dnorm * pl.reciprocal((dnorm + eps) * (chn + eps), approx=True)
    s_new = jnp.sum(pv * dv, axis=0) * scale + s_lin                 # (bt, P)

    @pl.when(l < n_layers - 1)                 # hidden layer: activation + skip
    def _():
        # --- VN-LeakyReLU on vector channels (learned direction) -------------
        k = jnp.dot(n.reshape(3 * bt, P).astype(bf16), wact_ref[0],
                    preferred_element_type=f32).reshape(3, bt, P)
        kinv = lax.rsqrt(jnp.sum(k * k, axis=0) + eps * eps)         # (bt, P)
        ku = k * kinv[None]                                          # unit dirs
        d_nk = jnp.sum(n * ku, axis=0)                               # (bt, P)
        delta = _leaky(d_nk, neg_slope) - d_nk
        n_act = n + delta[None] * ku
        s_act = _leaky(s_new, neg_slope)

        skipf = skip_ref[l].astype(f32)        # 0.0 / 1.0 residual flag (SMEM)
        v_sc[...] = n_act + skipf * v
        s_sc[...] = s_act + skipf * s

    @pl.when(l == n_layers - 1)                # head: lane-dense unmasked stores
    def _():
        vo_ref[...] = n
        so_ref[...] = s_new


# ----------------------------------------------------------------------------- #
# Parameter init (deterministic, synthetic) + packing into fused padded slabs.
# ----------------------------------------------------------------------------- #
def _lin(key, fan_in, fan_out):
    return jax.random.normal(key, (fan_in, fan_out), jnp.float32) / np.sqrt(fan_in)


def _init_vec_layer(key, v_in, v_out, s_in, s_out, with_act):
    k = jax.random.split(key, 8)
    p = {
        "Wv":   _lin(k[0], v_in, v_out),
        "Ws2v": _lin(k[1], s_in, v_out),
        "bs2v": jax.random.normal(k[2], (1, v_out), jnp.float32) * 0.01,
        "Wv2s": _lin(k[3], v_in, s_out),
        "Wdir": _lin(k[4], v_in, s_out),
        "Ws2s": _lin(k[5], s_in, s_out),
        "bs2s": jax.random.normal(k[6], (1, s_out), jnp.float32) * 0.01,
    }
    if with_act:
        p["Wact"] = _lin(k[7], v_out, v_out)
    return p


def _pad_to(a, rows, cols):
    return jnp.pad(a, ((0, rows - a.shape[0]), (0, cols - a.shape[1])))


def init_model(key, latent_dim, hidden_dims, scalar_hidden_dims, max_freq,
               num_bands, std=0.2):
    del max_freq
    # TODO(synk): FourierFeatures reference not provided; Gaussian random Fourier
    # features  emb = [cos(2*pi*t*w), sin(2*pi*t*w)], w ~ N(0, std^2).
    t_emb_dim = 2 * num_bands
    keys = jax.random.split(key, len(hidden_dims) + 2)
    fourier_w = jax.random.normal(keys[0], (num_bands,), jnp.float32) * std

    layers_raw, skips, dims = [], [], []
    v_in = s_in = latent_dim + t_emb_dim
    dims += [v_in, s_in]
    for i, h in enumerate(hidden_dims):
        layers_raw.append(_init_vec_layer(keys[i + 1], v_in, h, s_in,
                                          scalar_hidden_dims[i], with_act=True))
        skips.append(v_in == h and s_in == scalar_hidden_dims[i])
        dims += [h, scalar_hidden_dims[i]]
        v_in, s_in = h, scalar_hidden_dims[i]
    head_raw = _init_vec_layer(keys[-1], hidden_dims[-1], latent_dim,
                               scalar_hidden_dims[-1], latent_dim, with_act=False)
    dims += [latent_dim, latent_dim]

    # Shared 128-lane padded channel width.
    P = int(np.ceil(max(dims) / LANE)) * LANE

    def pack(p):
        wvec = jnp.concatenate([_pad_to(p["Wv"], P, P),
                                _pad_to(p["Wv2s"], P, P),
                                _pad_to(p["Wdir"], P, P)], axis=1)       # (P, 3P)
        wscal = jnp.concatenate([_pad_to(p["Ws2v"], P, P),
                                 _pad_to(p["Ws2s"], P, P)], axis=1)      # (P, 2P)
        bscal = jnp.concatenate([_pad_to(p["bs2v"], 1, P),
                                 _pad_to(p["bs2s"], 1, P)], axis=1)      # (1, 2P)
        return wvec, wscal, bscal

    all_layers = layers_raw + [head_raw]
    wvecs, wscals, bscals = zip(*[pack(p) for p in all_layers])
    wacts = [_pad_to(p["Wact"], P, P) for p in layers_raw]
    wacts.append(jnp.zeros((P, P), jnp.float32))    # dummy block for the head step

    params = {
        "fourier_w": fourier_w,
        # bf16 weight slabs: halves HBM->VMEM DMA & VMEM residency; f32 accum kept.
        "Wvec": jnp.stack(wvecs).astype(jnp.bfloat16),    # (L+1, P, 3P)
        "Wscal": jnp.stack(wscals).astype(jnp.bfloat16),  # (L+1, P, 2P)
        "bscal": jnp.stack(bscals),                       # (L+1, 1, 2P) f32
        "Wact": jnp.stack(wacts).astype(jnp.bfloat16),    # (L+1, P, P)
        "skip_flags": jnp.array([int(sk) for sk in skips] + [0], jnp.int32),
    }
    return params


# ----------------------------------------------------------------------------- #
# Forward pass (mirrors LatentDiffusionModel.forward) — one pallas_call total.
# ----------------------------------------------------------------------------- #
@jax.jit
def ldm_forward(params, z_so3, z_inv, t):
    # z_so3: (B, latent_dim, 3) torch layout; z_inv: (B, latent_dim); t: (B,)
    B, latent_dim, _ = z_so3.shape
    L_total, P, _ = params["Wvec"].shape

    t = t / 1000.0
    f = 2.0 * np.pi * t[:, None] * params["fourier_w"][None, :]          # (B, nb)
    t_emb = jnp.concatenate([jnp.cos(f), jnp.sin(f)], axis=-1)           # (B, 2nb)
    d0 = latent_dim + t_emb.shape[1]

    # Pad the batch to the 8-row sublane boundary so xyz blocks / stores align.
    Bpad = _round_up(max(B, SUBLANE), SUBLANE)

    s0 = jnp.concatenate([z_inv, t_emb], axis=1)                         # (B, d0)
    # t_emb_x = t_emb.unsqueeze(2).repeat(1,1,3): same embedding on x/y/z planes
    v0 = jnp.stack([jnp.concatenate([z_so3[:, :, c], t_emb], axis=1)
                    for c in range(3)], axis=0)                          # (3, B, d0)

    s0 = jnp.pad(s0, ((0, Bpad - B), (0, P - d0)))                       # (Bpad, P)
    v0 = jnp.pad(v0, ((0, 0), (0, Bpad - B), (0, P - d0)))               # (3, Bpad, P)

    # Batch tile: largest power-of-two-ish tile (<=256 rows) dividing Bpad.
    bt = SUBLANE
    for cand in (256, 128, 64, 32, 16, 8):
        if Bpad % cand == 0:
            bt = cand
            break
    n_bt = Bpad // bt

    kernel = functools.partial(_ldm_layer_kernel, P=P, bt=bt,
                               neg_slope=NEG_SLOPE, eps=EPS)

    w_map = lambda b, l, sk: (l, 0, 0)       # stream one layer's slab per step
    grid_spec = pltpu.PrefetchScalarGridSpec(
        num_scalar_prefetch=1,               # skip flags -> SMEM
        grid=(n_bt, L_total),                # (batch tiles, layers)
        in_specs=[
            pl.BlockSpec((3, bt, P), lambda b, l, sk: (0, b, 0)),        # v0
            pl.BlockSpec((bt, P), lambda b, l, sk: (b, 0)),              # s0
            pl.BlockSpec((1, P, 3 * P), w_map),                          # Wvec
            pl.BlockSpec((1, P, 2 * P), w_map),                          # Wscal
            pl.BlockSpec((1, 1, 2 * P), w_map),                          # bscal
            pl.BlockSpec((1, P, P), w_map),                              # Wact
        ],
        out_specs=(
            pl.BlockSpec((3, bt, P), lambda b, l, sk: (0, b, 0)),        # v out
            pl.BlockSpec((bt, P), lambda b, l, sk: (b, 0)),              # s out
        ),
        scratch_shapes=[pltpu.VMEM((3, bt, P), jnp.float32),             # v carry
                        pltpu.VMEM((bt, P), jnp.float32)],               # s carry
    )

    # VMEM budget: ~2 layers of bf16 slabs (double buffer) + activations, with
    # headroom; clamped to v7x's 64 MiB physical VMEM per TensorCore.
    per_layer_w = 6 * P * P * 2 + 2 * P * 4
    act_bytes = (3 * bt * P + bt * P) * 4
    est = 4 * per_layer_w + 10 * act_bytes + (2 << 20)
    vmem_limit = int(min(64 << 20, max(32 << 20, est)))

    eq_flops = 2 * (3 * Bpad) * P * (3 * P)
    sc_flops = 2 * Bpad * P * (2 * P)
    act_flops = 2 * (3 * Bpad) * P * P
    cost = pl.CostEstimate(
        flops=int(L_total * (eq_flops + sc_flops) + (L_total - 1) * act_flops),
        transcendentals=int(L_total * Bpad * P * 3),
        bytes_accessed=int(n_bt * L_total * per_layer_w
                           + 2 * (3 * Bpad * P + Bpad * P) * 4),
    )

    v_out, s_out = pl.pallas_call(
        kernel,
        out_shape=(jax.ShapeDtypeStruct((3, Bpad, P), jnp.float32),
                   jax.ShapeDtypeStruct((Bpad, P), jnp.float32)),
        grid_spec=grid_spec,
        compiler_params=pltpu.CompilerParams(
            dimension_semantics=("parallel", "arbitrary"),
            vmem_limit_bytes=vmem_limit),
        cost_estimate=cost,
    )(params["skip_flags"], v0, s0, params["Wvec"], params["Wscal"],
      params["bscal"], params["Wact"])

    pred_z_so3 = jnp.transpose(v_out[:, :B, :latent_dim], (1, 2, 0))     # (B, L, 3)
    pred_z_inv = s_out[:B, :latent_dim]                                  # (B, L)
    return pred_z_so3, pred_z_inv


if __name__ == "__main__":
    latent_dim = 16
    hidden_dims = [32, 32]
    scalar_hidden_dims = [32, 32]
    max_freq, num_bands, std = 4, 8, 0.2
    B = 2

    key = jax.random.PRNGKey(0)
    k_param, k_so3, k_inv, k_t = jax.random.split(key, 4)

    params = init_model(k_param, latent_dim, hidden_dims, scalar_hidden_dims,
                        max_freq, num_bands, std)

    z_so3 = jax.random.normal(k_so3, (B, latent_dim, 3), jnp.float32)
    z_inv = jax.random.normal(k_inv, (B, latent_dim), jnp.float32)
    t = jax.random.uniform(k_t, (B,), jnp.float32, 0.0, 1000.0)

    pred_z_so3, pred_z_inv = ldm_forward(params, z_so3, z_inv, t)
    pred_z_so3 = jax.block_until_ready(pred_z_so3)
    pred_z_inv = jax.block_until_ready(pred_z_inv)

    assert pred_z_so3.shape == (B, latent_dim, 3)
    assert pred_z_inv.shape == (B, latent_dim)
    assert bool(jnp.all(jnp.isfinite(pred_z_so3)))
    assert bool(jnp.all(jnp.isfinite(pred_z_inv)))
    print("KERNEL_OK")
</pallas_src>

<mosaic_0001>
module attributes {stable_mosaic.version = 11 : i64} {
  func.func @_ldm_layer_kernel(%arg0: i32, %arg1: i32, %arg2: memref<3xi32, #tpu.memory_space<smem>>, %arg3: memref<3x8x128xf32, #tpu.memory_space<vmem>>, %arg4: memref<8x128xf32, #tpu.memory_space<vmem>>, %arg5: memref<1x128x384xbf16, #tpu.memory_space<vmem>>, %arg6: memref<1x128x256xbf16, #tpu.memory_space<vmem>>, %arg7: memref<1x1x256xf32, #tpu.memory_space<vmem>>, %arg8: memref<1x128x128xbf16, #tpu.memory_space<vmem>>, %arg9: memref<3x8x128xf32, #tpu.memory_space<vmem>>, %arg10: memref<8x128xf32, #tpu.memory_space<vmem>>, %arg11: memref<3x8x128xf32, #tpu.memory_space<vmem>>, %arg12: memref<8x128xf32, #tpu.memory_space<vmem>>) attributes {dimension_semantics = [#tpu.dimension_semantics<parallel>, #tpu.dimension_semantics<arbitrary>], iteration_bounds = array<i64: 1, 3>, scalar_prefetch = 1 : i64, scratch_operands = 2 : i64, tpu.core_type = #tpu.core_type<tc>, window_params = [{transform_indices = @transform_0, window_bounds = array<i64: 3, 8, 128>}, {transform_indices = @transform_1, window_bounds = array<i64: 8, 128>}, {transform_indices = @transform_2, window_bounds = array<i64: 1, 128, 384>}, {transform_indices = @transform_3, window_bounds = array<i64: 1, 128, 256>}, {transform_indices = @transform_4, window_bounds = array<i64: 1, 1, 256>}, {transform_indices = @transform_5, window_bounds = array<i64: 1, 128, 128>}, {transform_indices = @transform_6, window_bounds = array<i64: 3, 8, 128>}, {transform_indices = @transform_7, window_bounds = array<i64: 8, 128>}]} {
    %c0_i32 = arith.constant 0 : i32
    %0 = arith.cmpi eq, %arg1, %c0_i32 : i32
    %1 = arith.extui %0 : i1 to i32
    %c0_i32_0 = arith.constant 0 : i32
    %2 = arith.cmpi ne, %1, %c0_i32_0 : i32
    scf.if %2 {
      %c0_23 = arith.constant 0 : index
      %c0_24 = arith.constant 0 : index
      %c0_25 = arith.constant 0 : index
      %51 = vector.load %arg3[%c0_23, %c0_24, %c0_25] : memref<3x8x128xf32, #tpu.memory_space<vmem>>, vector<3x8x128xf32>
      %c0_26 = arith.constant 0 : index
      %c0_27 = arith.constant 0 : index
      %c0_28 = arith.constant 0 : index
      %52 = vector.load %arg11[%c0_26, %c0_27, %c0_28] : memref<3x8x128xf32, #tpu.memory_space<vmem>>, vector<3x8x128xf32>
      tpu.vector_store %arg11[%c0_26, %c0_27, %c0_28], %51 {strides = array<i32>} : memref<3x8x128xf32, #tpu.memory_space<vmem>>, vector<3x8x128xf32>,
      %c0_29 = arith.constant 0 : index
      %c0_30 = arith.constant 0 : index
      %53 = vector.load %arg4[%c0_29, %c0_30] : memref<8x128xf32, #tpu.memory_space<vmem>>, vector<8x128xf32>
      %c0_31 = arith.constant 0 : index
      %c0_32 = arith.constant 0 : index
      %54 = vector.load %arg12[%c0_31, %c0_32] : memref<8x128xf32, #tpu.memory_space<vmem>>, vector<8x128xf32>
      tpu.vector_store %arg12[%c0_31, %c0_32], %53 {strides = array<i32>} : memref<8x128xf32, #tpu.memory_space<vmem>>, vector<8x128xf32>,
    } else {
    }
    %c0 = arith.constant 0 : index
    %c0_1 = arith.constant 0 : index
    %c0_2 = arith.constant 0 : index
    %3 = vector.load %arg11[%c0, %c0_1, %c0_2] : memref<3x8x128xf32, #tpu.memory_space<vmem>>, vector<3x8x128xf32>
    %c0_3 = arith.constant 0 : index
    %c0_4 = arith.constant 0 : index
    %4 = vector.load %arg12[%c0_3, %c0_4] : memref<8x128xf32, #tpu.memory_space<vmem>>, vector<8x128xf32>
    %5 = vector.shape_cast %3 : vector<3x8x128xf32> to vector<24x128xf32>
    %6 = arith.truncf %5 : vector<24x128xf32> to vector<24x128xbf16>
    %c0_5 = arith.constant 0 : index
    %c0_6 = arith.constant 0 : index
    %c0_7 = arith.constant 0 : index
    %7 = vector.load %arg5[%c0_5, %c0_6, %c0_7] : memref<1x128x384xbf16, #tpu.memory_space<vmem>>, vector<1x128x384xbf16>
    %8 = vector.shape_cast %7 : vector<1x128x384xbf16> to vector<128x384xbf16>
    %cst = arith.constant dense<0.000000e+00> : vector<24x384xf32>
    %9 = tpu.matmul %6, %8, %cst {dimension_numbers = #tpu.dot_dimension_numbers<[1], [0], [0], [1], [0, 0, 1, 1], [], []>} : vector<24x128xbf16>, vector<128x384xbf16>, vector<24x384xf32> -> vector<24x384xf32>
    %10 = vector.shape_cast %9 : vector<24x384xf32> to vector<3x8x384xf32>
    %11 = arith.truncf %4 : vector<8x128xf32> to vector<8x128xbf16>
    %c0_8 = arith.constant 0 : index
    %c0_9 = arith.constant 0 : index
    %c0_10 = arith.constant 0 : index
    %12 = vector.load %arg6[%c0_8, %c0_9, %c0_10] : memref<1x128x256xbf16, #tpu.memory_space<vmem>>, vector<1x128x256xbf16>
    %13 = vector.shape_cast %12 : vector<1x128x256xbf16> to vector<128x256xbf16>
    %cst_11 = arith.constant dense<0.000000e+00> : vector<8x256xf32>
    %14 = tpu.matmul %11, %13, %cst_11 {dimension_numbers = #tpu.dot_dimension_numbers<[1], [0], [0], [1], [0, 0, 1, 1], [], []>} : vector<8x128xbf16>, vector<128x256xbf16>, vector<8x256xf32> -> vector<8x256xf32>
    %c0_12 = arith.constant 0 : index
    %c0_13 = arith.constant 0 : index
    %c0_14 = arith.constant 0 : index
    %15 = vector.load %arg7[%c0_12, %c0_13, %c0_14] : memref<1x1x256xf32, #tpu.memory_space<vmem>>, vector<1x1x256xf32>
    %16 = vector.shape_cast %15 : vector<1x1x256xf32> to vector<1x256xf32>
    %17 = vector.broadcast %16 : vector<1x256xf32> to vector<8x256xf32>
    %18 = arith.addf %14, %17 : vector<8x256xf32>
    %19 = vector.extract_strided_slice %18 {offsets = [0, 0], sizes = [8, 128], strides = [1, 1]} : vector<8x256xf32> to vector<8x128xf32>
    %20 = vector.extract_strided_slice %18 {offsets = [0, 128], sizes = [8, 128], strides = [1, 1]} : vector<8x256xf32> to vector<8x128xf32>
    %21 = vector.extract_strided_slice %10 {offsets = [0, 0, 0], sizes = [3, 8, 128], strides = [1, 1, 1]} : vector<3x8x384xf32> to vector<3x8x128xf32>
    %22 = vector.shape_cast %19 : vector<8x128xf32> to vector<1x8x128xf32>
    %23 = vector.broadcast %22 : vector<1x8x128xf32> to vector<3x8x128xf32>
    %24 = arith.mulf %21, %23 : vector<3x8x128xf32>
    %25 = vector.extract_strided_slice %10 {offsets = [0, 0, 128], sizes = [3, 8, 128], strides = [1, 1, 1]} : vector<3x8x384xf32> to vector<3x8x128xf32>
    %26 = vector.extract_strided_slice %10 {offsets = [0, 0, 256], sizes = [3, 8, 128], strides = [1, 1, 1]} : vector<3x8x384xf32> to vector<3x8x128xf32>
    %27 = arith.mulf %26, %26 : vector<3x8x128xf32>
    %cst_15 = arith.constant dense<0.000000e+00> : vector<8x128xf32>
    %28 = vector.multi_reduction <add>, %27, %cst_15 [0] : vector<3x8x128xf32> to vector<8x128xf32>
    %29 = math.sqrt %28 : vector<8x128xf32>
    %cst_16 = arith.constant dense<0.000000e+00> : vector<8xf32>
    %30 = vector.multi_reduction <add>, %28, %cst_16 [1] : vector<8x128xf32> to vector<8xf32>
    %31 = vector.shape_cast %30 : vector<8xf32> to vector<8x1xf32>
    %32 = math.sqrt %31 : vector<8x1xf32>
    %cst_17 = arith.constant 9.99999997E-7 : f32
    %33 = vector.broadcast %cst_17 : f32 to vector<8x128xf32>
    %34 = arith.addf %29, %33 : vector<8x128xf32>
    %cst_18 = arith.constant 9.99999997E-7 : f32
    %35 = vector.broadcast %cst_18 : f32 to vector<8x1xf32>
    %36 = arith.addf %32, %35 : vector<8x1xf32>
    %37 = vector.broadcast %36 : vector<8x1xf32> to vector<8x128xf32>
    %38 = arith.mulf %34, %37 : vector<8x128xf32>
    %39 = tpu.reciprocal %38 {approx = true} : vector<8x128xf32> -> vector<8x128xf32>
    %40 = arith.mulf %29, %39 : vector<8x128xf32>
    %41 = arith.mulf %25, %26 : vector<3x8x128xf32>
    %cst_19 = arith.constant dense<0.000000e+00> : vector<8x128xf32>
    %42 = vector.multi_reduction <add>, %41, %cst_19 [0] : vector<3x8x128xf32> to vector<8x128xf32>
    %43 = arith.mulf %42, %40 : vector<8x128xf32>
    %44 = arith.addf %43, %20 : vector<8x128xf32>
    %c2_i32 = arith.constant 2 : i32
    %45 = arith.cmpi slt, %arg1, %c2_i32 : i32
    %46 = arith.extui %45 : i1 to i32
    %c0_i32_20 = arith.constant 0 : i32
    %47 = arith.cmpi ne, %46, %c0_i32_20 : i32
    scf.if %47 {
      %51 = vector.shape_cast %24 : vector<3x8x128xf32> to vector<24x128xf32>
      %52 = arith.truncf %51 : vector<24x128xf32> to vector<24x128xbf16>
      %c0_23 = arith.constant 0 : index
      %c0_24 = arith.constant 0 : index
      %c0_25 = arith.constant 0 : index
      %53 = vector.load %arg8[%c0_23, %c0_24, %c0_25] : memref<1x128x128xbf16, #tpu.memory_space<vmem>>, vector<1x128x128xbf16>
      %54 = vector.shape_cast %53 : vector<1x128x128xbf16> to vector<128x128xbf16>
      %cst_26 = arith.constant dense<0.000000e+00> : vector<24x128xf32>
      %55 = tpu.matmul %52, %54, %cst_26 {dimension_numbers = #tpu.dot_dimension_numbers<[1], [0], [0], [1], [0, 0, 1, 1], [], []>} : vector<24x128xbf16>, vector<128x128xbf16>, vector<24x128xf32> -> vector<24x128xf32>
      %56 = vector.shape_cast %55 : vector<24x128xf32> to vector<3x8x128xf32>
      %57 = arith.mulf %56, %56 : vector<3x8x128xf32>
      %cst_27 = arith.constant dense<0.000000e+00> : vector<8x128xf32>
      %58 = vector.multi_reduction <add>, %57, %cst_27 [0] : vector<3x8x128xf32> to vector<8x128xf32>
      %cst_28 = arith.constant 9.99999996E-13 : f32
      %59 = vector.broadcast %cst_28 : f32 to vector<8x128xf32>
      %60 = arith.addf %58, %59 : vector<8x128xf32>
      %61 = math.rsqrt %60 : vector<8x128xf32>
      %62 = vector.shape_cast %61 : vector<8x128xf32> to vector<1x8x128xf32>
      %63 = vector.broadcast %62 : vector<1x8x128xf32> to vector<3x8x128xf32>
      %64 = arith.mulf %56, %63 : vector<3x8x128xf32>
      %65 = arith.mulf %24, %64 : vector<3x8x128xf32>
      %cst_29 = arith.constant dense<0.000000e+00> : vector<8x128xf32>
      %66 = vector.multi_reduction <add>, %65, %cst_29 [0] : vector<3x8x128xf32> to vector<8x128xf32>
      %cst_30 = arith.constant 0.000000e+00 : f32
      %67 = vector.broadcast %cst_30 : f32 to vector<8x128xf32>
      %68 = arith.cmpf oge, %66, %67 : vector<8x128xf32>
      %cst_31 = arith.constant 2.000000e-01 : f32
      %69 = vector.broadcast %cst_31 : f32 to vector<8x128xf32>
      %70 = arith.mulf %69, %66 : vector<8x128xf32>
      %71 = arith.select %68, %66, %70 : vector<8x128xi1>, vector<8x128xf32>
      %72 = arith.subf %71, %66 : vector<8x128xf32>
      %73 = vector.shape_cast %72 : vector<8x128xf32> to vector<1x8x128xf32>
      %74 = vector.broadcast %73 : vector<1x8x128xf32> to vector<3x8x128xf32>
      %75 = arith.mulf %74, %64 : vector<3x8x128xf32>
      %76 = arith.addf %24, %75 : vector<3x8x128xf32>
      %cst_32 = arith.constant 0.000000e+00 : f32
      %77 = vector.broadcast %cst_32 : f32 to vector<8x128xf32>
      %78 = arith.cmpf oge, %44, %77 : vector<8x128xf32>
      %cst_33 = arith.constant 2.000000e-01 : f32
      %79 = vector.broadcast %cst_33 : f32 to vector<8x128xf32>
      %80 = arith.mulf %79, %44 : vector<8x128xf32>
      %81 = arith.select %78, %44, %80 : vector<8x128xi1>, vector<8x128xf32>
      %82 = arith.index_cast %arg1 : i32 to index
      %83 = memref.load %arg2[%82] : memref<3xi32, #tpu.memory_space<smem>>
      %84 = arith.sitofp %83 : i32 to f32
      %85 = vector.broadcast %84 : f32 to vector<3x8x128xf32>
      %86 = arith.mulf %85, %3 : vector<3x8x128xf32>
      %87 = arith.addf %76, %86 : vector<3x8x128xf32>
      %c0_34 = arith.constant 0 : index
      %c0_35 = arith.constant 0 : index
      %c0_36 = arith.constant 0 : index
      %88 = vector.load %arg11[%c0_34, %c0_35, %c0_36] : memref<3x8x128xf32, #tpu.memory_space<vmem>>, vector<3x8x128xf32>
      tpu.vector_store %arg11[%c0_34, %c0_35, %c0_36], %87 {strides = array<i32>} : memref<3x8x128xf32, #tpu.memory_space<vmem>>, vector<3x8x128xf32>,
      %89 = vector.broadcast %84 : f32 to vector<8x128xf32>
      %90 = arith.mulf %89, %4 : vector<8x128xf32>
      %91 = arith.addf %81, %90 : vector<8x128xf32>
      %c0_37 = arith.constant 0 : index
      %c0_38 = arith.constant 0 : index
      %92 = vector.load %arg12[%c0_37, %c0_38] : memref<8x128xf32, #tpu.memory_space<vmem>>, vector<8x128xf32>
      tpu.vector_store %arg12[%c0_37, %c0_38], %91 {strides = array<i32>} : memref<8x128xf32, #tpu.memory_space<vmem>>, vector<8x128xf32>,
    } else {
    }
    %c2_i32_21 = arith.constant 2 : i32
    %48 = arith.cmpi eq, %arg1, %c2_i32_21 : i32
    %49 = arith.extui %48 : i1 to i32
    %c0_i32_22 = arith.constant 0 : i32
    %50 = arith.cmpi ne, %49, %c0_i32_22 : i32
    scf.if %50 {
      %c0_23 = arith.constant 0 : index
      %c0_24 = arith.constant 0 : index
      %c0_25 = arith.constant 0 : index
      %51 = vector.load %arg9[%c0_23, %c0_24, %c0_25] : memref<3x8x128xf32, #tpu.memory_space<vmem>>, vector<3x8x128xf32>
      tpu.vector_store %arg9[%c0_23, %c0_24, %c0_25], %24 {strides = array<i32>} : memref<3x8x128xf32, #tpu.memory_space<vmem>>, vector<3x8x128xf32>,
      %c0_26 = arith.constant 0 : index
      %c0_27 = arith.constant 0 : index
      %52 = vector.load %arg10[%c0_26, %c0_27] : memref<8x128xf32, #tpu.memory_space<vmem>>, vector<8x128xf32>
      tpu.vector_store %arg10[%c0_26, %c0_27], %44 {strides = array<i32>} : memref<8x128xf32, #tpu.memory_space<vmem>>, vector<8x128xf32>,
    } else {
    }
    return
  }
  func.func @transform_0(%arg0: i32, %arg1: i32, %arg2: memref<3xi32, #tpu.memory_space<smem>>) -> (i32, i32, i32) {
    %c0_i32 = arith.constant 0 : i32
    %c0_i32_0 = arith.constant 0 : i32
    %c0_i32_1 = arith.constant 0 : i32
    return %c0_i32, %arg0, %c0_i32_0 : i32, i32, i32
  }
  func.func @transform_1(%arg0: i32, %arg1: i32, %arg2: memref<3xi32, #tpu.memory_space<smem>>) -> (i32, i32) {
    %c0_i32 = arith.constant 0 : i32
    %c0_i32_0 = arith.constant 0 : i32
    return %arg0, %c0_i32 : i32, i32
  }
  func.func @transform_2(%arg0: i32, %arg1: i32, %arg2: memref<3xi32, #tpu.memory_space<smem>>) -> (i32, i32, i32) {
    %c0_i32 = arith.constant 0 : i32
    %c0_i32_0 = arith.constant 0 : i32
    %c0_i32_1 = arith.constant 0 : i32
    return %arg1, %c0_i32, %c0_i32_0 : i32, i32, i32
  }
  func.func @transform_3(%arg0: i32, %arg1: i32, %arg2: memref<3xi32, #tpu.memory_space<smem>>) -> (i32, i32, i32) {
    %c0_i32 = arith.constant 0 : i32
    %c0_i32_0 = arith.constant 0 : i32
    %c0_i32_1 = arith.constant 0 : i32
    return %arg1, %c0_i32, %c0_i32_0 : i32, i32, i32
  }
  func.func @transform_4(%arg0: i32, %arg1: i32, %arg2: memref<3xi32, #tpu.memory_space<smem>>) -> (i32, i32, i32) {
    %c0_i32 = arith.constant 0 : i32
    %c0_i32_0 = arith.constant 0 : i32
    %c0_i32_1 = arith.constant 0 : i32
    return %arg1, %c0_i32, %c0_i32_0 : i32, i32, i32
  }
  func.func @transform_5(%arg0: i32, %arg1: i32, %arg2: memref<3xi32, #tpu.memory_space<smem>>) -> (i32, i32, i32) {
    %c0_i32 = arith.constant 0 : i32
    %c0_i32_0 = arith.constant 0 : i32
    %c0_i32_1 = arith.constant 0 : i32
    return %arg1, %c0_i32, %c0_i32_0 : i32, i32, i32
  }
  func.func @transform_6(%arg0: i32, %arg1: i32, %arg2: memref<3xi32, #tpu.memory_space<smem>>) -> (i32, i32, i32) {
    %c0_i32 = arith.constant 0 : i32
    %c0_i32_0 = arith.constant 0 : i32
    %c0_i32_1 = arith.constant 0 : i32
    return %c0_i32, %arg0, %c0_i32_0 : i32, i32, i32
  }
  func.func @transform_7(%arg0: i32, %arg1: i32, %arg2: memref<3xi32, #tpu.memory_space<smem>>) -> (i32, i32) {
    %c0_i32 = arith.constant 0 : i32
    %c0_i32_0 = arith.constant 0 : i32
    return %arg0, %c0_i32 : i32, i32
  }
}

</mosaic_0001>

<bundles_post_ra>
// kernel: ldm_forward.1
= control target key start
LH: loop header
LB: loop body
LE: loop exit
PB: predicated region body
PF: predicated region fallthrough
CT: control target
= control target key end

     0   :  { %s1717_s30 = smov [#allocation5]   ;;  %s2065_s0 = inlined_call_operand.vmem [shape: s32[3], index: 0, kind: input, shape index: {}]   ;;  %s2066_s1 = inlined_call_operand.vmem [shape: f32[3,8,128], index: 1, kind: input, shape index: {}]   ;;  %s2067_s2 = inlined_call_operand.vmem [shape: f32[8,128], index: 2, kind: input, shape index: {}]   ;;  %s2068_s3 = inlined_call_operand.hbm [shape: bf16[3,128,384], index: 3, kind: input, shape index: {}]   ;;  %s2069_s4 = inlined_call_operand.hbm [shape: bf16[3,128,256], index: 4, kind: input, shape index: {}]   ;;  %s2070_s5 = inlined_call_operand.vmem [shape: f32[3,1,256], index: 5, kind: input, shape index: {}]   ;;  %s2071_s6 = inlined_call_operand.hbm [shape: bf16[3,128,128], index: 6, kind: input, shape index: {}]   ;;  %s2072_s7 = inlined_call_operand.vmem [shape: f32[3,8,128], index: 7, kind: output, shape index: {0}]   ;;  %s2073_s8 = inlined_call_operand.vmem [shape: f32[8,128], index: 8, kind: output, shape index: {1}]  }
   0x1   :  { %2077 = sst [smem:[#allocation17_spill]] %s2069_s4  ;;  %s15_s29 = sshll.u32 %s2065_s0, 4  ;;  %s16_s29 = int_to_ptr.vmem [resolvable:$true] %s15_s29 }
   0x2   :  { %2078 = sst [smem:[#allocation18_spill]] %s2073_s8 }
   0x3   :  { %18 = dma.vmem_to_smem %s16_s29, 16, %s1717_s30, [#allocation4] }
   0x4   :  { %1683 = dma.done.wait [#allocation4], 16 }
   0x5   :  { %1684 = vsyncadd [#allocation4], 4294967280 }
   0x6   :  { %21 = sfence }
   0x7   :  { %22 = vsyncpa [#allocation7], 0 }
   0x8   :  { %24 = vsyncpa [#allocation7 + $0x1], 0 }
   0x9   :  { %25 = vsyncpa [#allocation9], 0 }
   0xa   :  { %27 = vsyncpa [#allocation9 + $0x1], 0  ;;  %s1772_s9 = smov 0   ;;  %s1774_s10 = smov 0  }
   0xb   :  { %s1776_s11 = smov 0   ;;  %s1778_s12 = smov 0  }
   0xc   :  { %s1780_s13 = smov 0   ;;  %s1782_s0 = smov 0  }
   0xd LB: > { %2079 = sst [smem:[#allocation14_spill]] %s1703_s11  ;;  %s2074_s14 = sadd.s32 4294967295, %s1715_s0   ;;  %s1715_s0 = sphi %s1782_s0, %s33_s0   ;;  %s1711_s13 = sphi %s1780_s13, %s2094_s13   ;;  %s1707_s12 = sphi %s1778_s12, %s2093_s12   ;;  %s1703_s11 = sphi %s1776_s11, %s2089_s11   ;;  %s1699_s10 = sphi %s1774_s10, %s2092_s10   ;;  %s1695_s9 = sphi %s1772_s9, %s2091_s9  }
   0xe   : > { %s42_s15 = sadd.s32 1, %s1711_s13  ;;  %s104_s16 = sadd.s32 1, %s1703_s11 }
   0xf   : > { %p43_p0 = scmp.ge.s32.totalorder %s42_s15, 3  ;;  %p111_p1 = scmp.ne.s32.totalorder %s1703_s11, %s1699_s10 }
  0x10   : > { %p112_p2 = scmp.eq.s32.totalorder %s1715_s0, 0  ;;  %p117_p4 = scmp.ne.s32.totalorder %s1699_s10, %s1695_s9 }
  0x11   : > { %s2096_s15 = smov (%p43_p0, %s42_s15), 0  ;;  %p118_p5 = scmp.eq.s32.totalorder %s2074_s14, 0 }
  0x12   : > { %2080 = sst [smem:[#allocation15_spill]] %s2096_s15  ;;  %p113_p3 = por %p112_p2, %p111_p1 }
  0x13   : > { %s101_s17 = ssub.s32 %s1711_s13, %s2096_s15  ;;  %p1813_p7 = por %p118_p5, %p117_p4 }
  0x14   : > { %p102_p6 = scmp.eq.s32.totalorder %s101_s17, 0  ;;  %p1493_p8 = scmp.lt.s32.totalorder %s1715_s0, 3 }
  0x15   : > { %s1822_s20 = sand.u32 1, %s1703_s11   ;;  %s307_s22 = sand.u32 1, %s1715_s0  }
  0x16   : > { %s1819_s19 = scalar_select %p102_p6, %s1703_s11, %s104_s16  }
  0x17   : > { %p1824_p9 = pnand %p1493_p8, %p113_p3  ;;  %s1207_s23 = sshll.u32 %s1822_s20, 7 }
  0x18   : > { %2082 = sst [smem:[#allocation16_spill]] %s1819_s19  ;;  %s1416_s24 = sshll.u32 %s1711_s13, 7 }
  0x19   : > { %s2084_s4 = sld [smem:[#allocation17_spill]]  ;;  %s311_s28 = scalar_lea.vmem [#allocation8], %s1207_s23 }
  0x1a   : > { %s319_s29 = sshll.u32 %s311_s28, 4  ;;  %p1213_p10 = scmp.ge.s32.totalorder %s1715_s0, 1  ;;  %s320_s29 = int_to_ptr.vmem [resolvable:$true] %s319_s29 }
  0x1b   : > { %s1835_s9 = scalar_lea.sflag [#allocation9], %s307_s22  ;;  %s1718_s16 = smov 128  }
  0x1c   : > { %s1719_s17 = smov 8   ;;  %p356_p11 = scmp.lt.s32.totalorder %s1715_s0, 4 }
  0x1d   : > { %s1474_s23 = smul.u32 192, %s1822_s20  ;;  %s1417_s15 = sshll.u32 %s1711_s13, 6 }
  0x1e   : > { %p1841_p12 = pnand %p1213_p10, %p356_p11  ;;  %s1475_s25 = smul.u32 192, %s1711_s13 }
  0x1f   : > { %s316_s27 = scalar_lea.hbm %s2084_s4, %s1416_s24  ;;  %s289_s22 = scalar_lea.vmem [#allocation6], %s1474_s23 }
  0x20   : > { %s317_s30 = sshll.u32 %s316_s27, 4  ;;  %s294_s28 = scalar_lea.hbm %s2068_s3, %s1475_s25  ;;  %s318_s30 = int_to_ptr.hbm [resolvable:$true] %s317_s30 }
  0x21   : > { %1489 = dma.hbm_to_vmem [thread:$0]  (!%p1824_p9), %s318_s30, 2048, %s320_s29, %s1835_s9, %s1718_s16, %s1718_s16, %s1719_s17  }
  0x22   : > { %s297_s14 = sshll.u32 %s289_s22, 4  ;;  %s295_s4 = sshll.u32 %s294_s28, 4  ;;  %s298_s14 = int_to_ptr.vmem [resolvable:$true] %s297_s14  ;;  %s296_s4 = int_to_ptr.hbm [resolvable:$true] %s295_s4 }
  0x23   : > { %s1210_s29 = sshll.u32 %s1822_s20, 6  ;;  %s286_s30 = scalar_lea.sflag [#allocation7], %s1822_s20 }
  0x24   : > { %s1720_s16 = smov 192   ;;  %s1721_s17 = smov 12  }
  0x25   : > { %1486 = dma.hbm_to_vmem [thread:$0]  (!%p1824_p9), %s296_s4, 3072, %s298_s14, %s286_s30, %s1720_s16, %s1720_s16, %s1721_s17  }
  0x26   : > { %s345_s8 = scalar_lea.hbm %s2071_s6, %s1417_s15  ;;  %s340_s26 = scalar_lea.vmem [#allocation10], %s1210_s29 }
  0x27   : > { %s348_s25 = sshll.u32 %s340_s26, 4  ;;  %s346_s23 = sshll.u32 %s345_s8, 4  ;;  %s349_s25 = int_to_ptr.vmem [resolvable:$true] %s348_s25  ;;  %s347_s23 = int_to_ptr.hbm [resolvable:$true] %s346_s23 }
  0x28   : > { %s1722_s27 = smov 64   ;;  %s1723_s28 = smov 4  }
  0x29   : > { %1492 = dma.hbm_to_vmem [thread:$0]  (!%p1824_p9), %s347_s23, 1024, %s349_s25, %s1835_s9, %s1722_s27, %s1722_s27, %s1723_s28  }
  0x2a   : > { %360 = sbr.rel (%p1841_p12) target bundleno = 629 (0x275), region = 44  ;;  %s362_s4 = sand.u32 (!%p1841_p12), 1, %s1699_s10  }
  0x2b   : > { %s1476_s14 = smul.u32 (!%p1841_p12), 192, %s362_s4  ;;  %s363_s20 = scalar_lea.sflag (!%p1841_p12), [#allocation7], %s362_s4 }
  0x2d   : > { %s1864_s22 = scalar_lea.vmem (!%p1841_p12), [#allocation6], %s1476_s14 }
  0x2f   : > { %1686 = dma.done.wait (%p1813_p7), %s363_s20, 3072  }
  0x30   : > { %1688 = vsyncadd (%p1813_p7), %s363_s20, 4294964224  ;;  %s2086_s8 = sadd.s32 4294967295, %s1715_s0   ;;  %s1214_s15 = sshll.u32 %s362_s4, 7 }
  0x31   : > { %s372_s11 = sand.u32 1, %s2086_s8   ;;  %s1872_s21 = scalar_lea.vmem [#allocation8], %s1214_s15 }
  0x32   : > { %s373_s19 = scalar_lea.sflag [#allocation9], %s372_s11 }
  0x33   : > { %1690 = dma.done.wait (%p1813_p7), %s373_s19, 3072  }
  0x34   : > { %1692 = vsyncadd (%p1813_p7), %s373_s19, 4294964224  ;;  %s1215_s9 = sshll.u32 %s362_s4, 6  ;;  %p451_p13 = scmp.lt.s32.totalorder %s1707_s12, 2 }
  0x35   : > { %s1885_s26 = scalar_lea.vmem [#allocation10], %s1215_s9  ;;  %p1217_p0 = scmp.ne.s32.totalorder %s1707_s12, 0 }
  0x36   : > { %s452_s24 = scalar_select %p451_p13, %s1707_s12, 2 }
  0x37   : > { %466 = sbr.rel (%p1217_p0) target bundleno = 65 (0x41), region = 60 }
  0x38   : > { %s1216_s29 = sshll.u32 %s452_s24, 1 }
  0x39   : > { %s1883_s17 = scalar_lea.vmem %s2070_s5, %s1216_s29 }
  0x3c   : > { %v467_v0 = vld [vmem:[%s2066_s1] sm:$0xff]  ;;  %v468_v1 = vld [vmem:[%s2066_s1 + $0x8] sm:$0xff]  ;;  %v469_v2 = vld [vmem:[%s2066_s1 + $0x10] sm:$0xff] }
  0x3d   : > { %470 = vst [vmem:[#allocation2 + $0x10] sm:$0xff] %v467_v0  ;;  %v473_v3 = vld [vmem:[%s2067_s2] sm:$0xff] }
  0x3e   : > { %471 = vst [vmem:[#allocation2] sm:$0xff] %v468_v1 }
  0x3f   : > { %472 = vst [vmem:[#allocation2 + $0x8] sm:$0xff] %v469_v2 }
  0x40   : > { %474 = vst [vmem:[#allocation3] sm:$0xff] %v473_v3 }
  0x41 PF: > { %v1312_v4 = vld [vmem:[%s1864_s22 + $0xb0] sm:$0xf]  ;;  %v1441_v5 = vld [vmem:[%s1864_s22 + $0xb8] sm:$0xf0]  ;;  %v1300_v6 = vld [vmem:[%s1864_s22 + $0x98] sm:$0xf] }
  0x42   : > { %v1313_v7 = vor.u32 %v1441_v5, %v1312_v4  ;;  %v1438_v8 = vld [vmem:[%s1864_s22 + $0xa0] sm:$0xf0]  ;;  %v1439_v9 = vld [vmem:[%s1864_s22 + $0xac] sm:$0xf]  ;;  %v1306_v10 = vld [vmem:[%s1864_s22 + $0xb4] sm:$0xf0] }
  0x43   : > { %v1309_v11 = vor.u32 %v1439_v9, %v1306_v10  ;;  %v1436_v12 = vld [vmem:[%s1864_s22 + $0x94] sm:$0xf]  ;;  %v1301_v13 = vor.u32 %v1438_v8, %v1300_v6  ;;  %v1294_v14 = vld [vmem:[%s1864_s22 + $0x9c] sm:$0xf0]  ;;  %v1435_v16 = vld [vmem:[%s1864_s22 + $0x88] sm:$0xf0] }
  0x44   : > { %677 = vmatpush.bf16.msra.mxu2 %v1313_v7  ;;  %v1288_v15 = vld [vmem:[%s1864_s22 + $0x80] sm:$0xf]  ;;  %v1297_v17 = vor.u32 %v1436_v12, %v1294_v14  ;;  %v1433_v18 = vld [vmem:[%s1864_s22 + $0x7c] sm:$0xf]  ;;  %v1282_v19 = vld [vmem:[%s1864_s22 + $0x84] sm:$0xf0] }
  0x45   : > { %659 = vmatpush.bf16.msra.mxu1 %v1309_v11  ;;  %v1289_v20 = vor.u32 %v1435_v16, %v1288_v15  ;;  %v1276_v21 = vld [vmem:[%s1864_s22 + $0x68] sm:$0xf]  ;;  %v1432_v22 = vld [vmem:[%s1864_s22 + $0x70] sm:$0xf0]  ;;  %v1285_v23 = vor.u32 %v1433_v18, %v1282_v19  ;;  %v1430_v24 = vld [vmem:[%s1864_s22 + $0x64] sm:$0xf] }
  0x46   : > { %v1270_v25 = vld [vmem:[%s1864_s22 + $0x6c] sm:$0xf0]  ;;  %v1277_v26 = vor.u32 %v1432_v22, %v1276_v21  ;;  %v1429_v28 = vld [vmem:[%s1864_s22 + $0x58] sm:$0xf0]  ;;  %v1427_v30 = vld [vmem:[%s1864_s22 + $0x4c] sm:$0xf] }
  0x47   : > { %v1264_v27 = vld [vmem:[%s1864_s22 + $0x50] sm:$0xf]  ;;  %v1273_v29 = vor.u32 %v1430_v24, %v1270_v25  ;;  %v1258_v31 = vld [vmem:[%s1864_s22 + $0x54] sm:$0xf0]  ;;  %v1426_v34 = vld [vmem:[%s1864_s22 + $0x40] sm:$0xf0] }
  0x48   : > { %678 = vmatpush.bf16.msra.mxu2 %v1301_v13  ;;  %v1265_v32 = vor.u32 %v1429_v28, %v1264_v27  ;;  %v1252_v33 = vld [vmem:[%s1864_s22 + $0x38] sm:$0xf]  ;;  %v1261_v35 = vor.u32 %v1427_v30, %v1258_v31  ;;  %v1424_v36 = vld [vmem:[%s1864_s22 + $0x34] sm:$0xf]  ;;  %v1246_v37 = vld [vmem:[%s1864_s22 + $0x3c] sm:$0xf0] }
  0x49   : > { %660 = vmatpush.bf16.msra.mxu1 %v1297_v17  ;;  %v1240_v38 = vld [vmem:[%s1864_s22 + $0x20] sm:$0xf]  ;;  %v1423_v39 = vld [vmem:[%s1864_s22 + $0x28] sm:$0xf0]  ;;  %v1253_v40 = vor.u32 %v1426_v34, %v1252_v33  ;;  %v1421_v41 = vld [vmem:[%s1864_s22 + $0x1c] sm:$0xf]  ;;  %v1249_v45 = vor.u32 %v1424_v36, %v1246_v37 }
  0x4a   : > { %v1304_v42 = vld [vmem:[%s1864_s22 + $0xa8] sm:$0xf]  ;;  %v1440_v43 = vld [vmem:[%s1864_s22 + $0xb0] sm:$0xf0]  ;;  %v1372_v44 = vld [vmem:[%s1872_s21 + $0x70] sm:$0xf]  ;;  %v1241_v55 = vor.u32 %v1423_v39, %v1240_v38 }
  0x4b   : > { %v1305_v46 = vor.u32 %v1440_v43, %v1304_v42  ;;  %v1457_v47 = vld [vmem:[%s1872_s21 + $0x74] sm:$0xf0]  ;;  %v1292_v48 = vld [vmem:[%s1864_s22 + $0x90] sm:$0xf]  ;;  %v1437_v49 = vld [vmem:[%s1864_s22 + $0x98] sm:$0xf0] }
  0x4c   : > { %679 = vmatpush.bf16.msra.mxu2 %v1289_v20  ;;  %v1234_v50 = vld [vmem:[%s1864_s22 + $0x24] sm:$0xf0]  ;;  %v1373_v51 = vor.u32 %v1457_v47, %v1372_v44  ;;  %v1364_v52 = vld [vmem:[%s1872_s21 + $0x60] sm:$0xf]  ;;  %v1293_v54 = vor.u32 %v1437_v49, %v1292_v48  ;;  %v1280_v58 = vld [vmem:[%s1864_s22 + $0x78] sm:$0xf] }
  0x4d   : > { %661 = vmatpush.bf16.msra.mxu1 %v1285_v23  ;;  %v1455_v53 = vld [vmem:[%s1872_s21 + $0x64] sm:$0xf0]  ;;  %641 = vmatpush.bf16.msra.mxu0 %v1305_v46  ;;  %v1434_v59 = vld [vmem:[%s1864_s22 + $0x80] sm:$0xf0]  ;;  %v1420_v60 = vld [vmem:[%s1864_s22 + $0x10] sm:$0xf0]  ;;  %v1237_v61 = vor.u32 %v1421_v41, %v1234_v50 }
  0x4e   : > { %v1228_v56 = vld [vmem:[%s1864_s22 + $0x8] sm:$0xf]  ;;  %798 = vmatpush.bf16.msra.mxu3 %v1373_v51  ;;  %v1365_v57 = vor.u32 %v1455_v53, %v1364_v52  ;;  %v1356_v62 = vld [vmem:[%s1872_s21 + $0x50] sm:$0xf]  ;;  %v1453_v63 = vld [vmem:[%s1872_s21 + $0x54] sm:$0xf0]  ;;  %v1281_v3 = vor.u32 %v1434_v59, %v1280_v58 }
  0x4f   : > { %v1418_v0 = vld [vmem:[%s1864_s22 + $0x4] sm:$0xf]  ;;  %v1222_v1 = vld [vmem:[%s1864_s22 + $0xc] sm:$0xf0]  ;;  %v1229_v4 = vor.u32 %v1420_v60, %v1228_v56  ;;  %v1357_v6 = vor.u32 %v1453_v63, %v1356_v62  ;;  %v1268_v7 = vld [vmem:[%s1864_s22 + $0x60] sm:$0xf] }
  0x50   : > { %680 = vmatpush.bf16.msra.mxu2 %v1277_v26  ;;  %v1944_v2 = vld [vmem:[#allocation2 + $0x10] sm:$0xff]  ;;  %v1946_v5 = vld [vmem:[#allocation2] sm:$0xff]  ;;  %v1431_v8 = vld [vmem:[%s1864_s22 + $0x68] sm:$0xf0]  ;;  %v1225_v9 = vor.u32 %v1418_v0, %v1222_v1  ;;  %p1378_p1 = scmp.ge.s32.totalorder %s1707_s12, 2 }
  0x51   : > { %662 = vmatpush.bf16.msra.mxu1 %v1273_v29  ;;  %642 = vmatpush.bf16.msra.mxu0 %v1293_v54  ;;  %v1348_v10 = vld [vmem:[%s1872_s21 + $0x40] sm:$0xf]  ;;  %v1451_v11 = vld [vmem:[%s1872_s21 + $0x44] sm:$0xf0]  ;;  %v479_v12 = vpack.c.bf16 %v1946_v5, %v1944_v2  ;;  %v1269_v13 = vor.u32 %v1431_v8, %v1268_v7  ;;  %v1428_v16 = vld [vmem:[%s1864_s22 + $0x50] sm:$0xf0] }
  0x52   : > { %799 = vmatpush.bf16.msra.mxu3 %v1365_v57  ;;  %v1349_v14 = vor.u32 %v1451_v11, %v1348_v10  ;;  %v1256_v15 = vld [vmem:[%s1864_s22 + $0x48] sm:$0xf]  ;;  %v1340_v17 = vld [vmem:[%s1872_s21 + $0x30] sm:$0xf]  ;;  %v1449_v18 = vld [vmem:[%s1872_s21 + $0x34] sm:$0xf0] }
  0x53   : > { %v1257_v19 = vor.u32 %v1428_v16, %v1256_v15  ;;  %v1341_v20 = vor.u32 %v1449_v18, %v1340_v17  ;;  %v1244_v21 = vld [vmem:[%s1864_s22 + $0x30] sm:$0xf]  ;;  %v1425_v22 = vld [vmem:[%s1864_s22 + $0x38] sm:$0xf0]  ;;  %v1332_v23 = vld [vmem:[%s1872_s21 + $0x20] sm:$0xf] }
  0x54   : > { %681 = vmatpush.bf16.msra.mxu2 %v1265_v32  ;;  %v1447_v24 = vld [vmem:[%s1872_s21 + $0x24] sm:$0xf0]  ;;  %v1245_v25 = vor.u32 %v1425_v22, %v1244_v21  ;;  %v1232_v27 = vld [vmem:[%s1864_s22 + $0x18] sm:$0xf]  ;;  %v1422_v28 = vld [vmem:[%s1864_s22 + $0x20] sm:$0xf0] }
  0x55   : > { %663 = vmatpush.bf16.msra.mxu1 %v1261_v35  ;;  %643 = vmatpush.bf16.msra.mxu0 %v1281_v3  ;;  %v1333_v26 = vor.u32 %v1447_v24, %v1332_v23  ;;  %v1324_v29 = vld [vmem:[%s1872_s21 + $0x10] sm:$0xf]  ;;  %v1445_v30 = vld [vmem:[%s1872_s21 + $0x14] sm:$0xf0]  ;;  %v1233_v31 = vor.u32 %v1422_v28, %v1232_v27  ;;  %v1966_v32 = vld [vmem:[#allocation2 + $0x8] sm:$0xff] }
  0x56   : > { %800 = vmatpush.bf16.msra.mxu3 %v1357_v6  ;;  %v1325_v33 = vor.u32 %v1445_v30, %v1324_v29  ;;  %v1220_v34 = vld [vmem:[%s1864_s22] sm:$0xf]  ;;  %v1419_v35 = vld [vmem:[%s1864_s22 + $0x8] sm:$0xf0]  ;;  %v1443_v37 = vld [vmem:[%s1872_s21 + $0x4] sm:$0xf0]  ;;  %v480_v38 = vpack.c.bf16 %v1966_v32, %v1966_v32 }
  0x57   : > { %v1316_v36 = vld [vmem:[%s1872_s21] sm:$0xf]  ;;  %v1221_v39 = vor.u32 %v1419_v35, %v1220_v34  ;;  %v1974_v41 = vld [vmem:[#allocation3] sm:$0xff]  ;;  %v1456_v43 = vld [vmem:[%s1872_s21 + $0x74] sm:$0xf]  ;;  %s995_s22 = sld [smem:[#allocation5 + %s1707_s12]] (!%p1378_p1) }
  0x58   : > { %682 = vmatpush.bf16.msra.mxu2 %v1253_v40  ;;  %v1317_v40 = vor.u32 %v1443_v37, %v1316_v36  ;;  %v695_v42 = vpack.c.bf16 %v1974_v41, %v1974_v41  ;;  %v1374_v44 = vld [vmem:[%s1872_s21 + $0x78] sm:$0xf0]  ;;  %v1454_v46 = vld [vmem:[%s1872_s21 + $0x64] sm:$0xf]  ;;  %v1366_v47 = vld [vmem:[%s1872_s21 + $0x68] sm:$0xf0] }
  0x59   : > { %664 = vmatpush.bf16.msra.mxu1 %v1249_v45  ;;  %644 = vmatpush.bf16.msra.mxu0 %v1269_v13  ;;  %v1377_v45 = vor.u32 %v1456_v43, %v1374_v44  ;;  %v1369_v48 = vor.u32 %v1454_v46, %v1366_v47  ;;  %v1452_v49 = vld [vmem:[%s1872_s21 + $0x54] sm:$0xf]  ;;  %v1358_v50 = vld [vmem:[%s1872_s21 + $0x58] sm:$0xf0]  ;;  %v1450_v52 = vld [vmem:[%s1872_s21 + $0x44] sm:$0xf] }
  0x5a   : > { %801 = vmatpush.bf16.msra.mxu3 %v1349_v14  ;;  %v1361_v51 = vor.u32 %v1452_v49, %v1358_v50  ;;  %v1350_v53 = vld [vmem:[%s1872_s21 + $0x48] sm:$0xf0]  ;;  %v1342_v56 = vld [vmem:[%s1872_s21 + $0x38] sm:$0xf0]  ;;  %v1446_v58 = vld [vmem:[%s1872_s21 + $0x24] sm:$0xf] }
  0x5b   : > { %v1353_v54 = vor.u32 %v1450_v52, %v1350_v53  ;;  %v1334_v59 = vld [vmem:[%s1872_s21 + $0x28] sm:$0xf0]  ;;  %v1326_v62 = vld [vmem:[%s1872_s21 + $0x18] sm:$0xf0]  ;;  %v1442_v0 = vld [vmem:[%s1872_s21 + $0x4] sm:$0xf] }
  0x5c   : > { %683 = vmatpush.bf16.msra.mxu2 %v1241_v55  ;;  %v1448_v55 = vld [vmem:[%s1872_s21 + $0x34] sm:$0xf]  ;;  %v1337_v60 = vor.u32 %v1446_v58, %v1334_v59  ;;  %v1318_v1 = vld [vmem:[%s1872_s21 + $0x8] sm:$0xf0]  ;;  %v712_v24 = vld [vmem:[%s1883_s17] sm:$0x3] }
  0x5d   : > { %665 = vmatpush.bf16.msra.mxu1 %v1237_v61  ;;  %645 = vmatpush.bf16.msra.mxu0 %v1257_v19  ;;  %v1345_v57 = vor.u32 %v1448_v55, %v1342_v56  ;;  %v1444_v61 = vld [vmem:[%s1872_s21 + $0x14] sm:$0xf]  ;;  %v1321_v3 = vor.u32 %v1442_v0, %v1318_v1  ;;  %s996_s8 = scvt.s32.f32 (!%p1378_p1), %s995_s22 }
  0x5e   : > { %802 = vmatpush.bf16.msra.mxu3 %v1341_v20  ;;  %v1329_v63 = vor.u32 %v1444_v61, %v1326_v62 }
  0x60   : > { %684 = vmatpush.bf16.msra.mxu2 %v1229_v4 }
  0x61   : > { %666 = vmatpush.bf16.msra.mxu1 %v1225_v9  ;;  %646 = vmatpush.bf16.msra.mxu0 %v1245_v25  ;;  %v714_v25 = vperm.slane %v712_v24, 0 }
  0x62   : > { %803 = vmatpush.bf16.msra.mxu3 %v1333_v26 }
  0x63   : > { %685 = vmatmul.bf16.vlgmr.msra.gmra.mxu2 %v479_v12 }
  0x64   : > { %667 = vmatmul.bf16.vlgmr.msra.gmra.mxu1 %v479_v12 }
  0x65   : > { %647 = vmatpush.bf16.msra.mxu0 %v1233_v31 }
  0x66   : > { %804 = vmatpush.bf16.msra.mxu3 %v1325_v33 }
  0x69   : > { %648 = vmatpush.bf16.msra.mxu0 %v1221_v39 }
  0x6a   : > { %805 = vmatpush.bf16.msra.mxu3 %v1317_v40 }
  0x6c   : > { %649 = vmatmul.bf16.vlgmr.msra.gmra.mxu0 %v479_v12 }
  0x6d   : > { %806 = vmatmul.bf16.vlgmr.msra.gmra.mxu3 %v695_v42  ;;  %811 = vmatpush.bf16.msrb.mxu0 %v1377_v45 }
  0x71   : > { %812 = vmatpush.bf16.msrb.mxu0 %v1369_v48 }
  0x73   : > { %690 = vmatmul.bf16.gmra.mxu2 %v480_v38 }
  0x74   : > { %672 = vmatmul.bf16.gmra.mxu1 %v480_v38 }
  0x75   : > { %813 = vmatpush.bf16.msrb.mxu0 %v1361_v51 }
  0x79   : > { %814 = vmatpush.bf16.msrb.mxu0 %v1353_v54 }
  0x7c   : > { %654 = vmatmul.bf16.gmra.mxu0 %v480_v38 }
  0x7d   : > { %815 = vmatpush.bf16.msrb.mxu0 %v1345_v57 }
  0x81   : > { %816 = vmatpush.bf16.msrb.mxu0 %v1337_v60 }
  0x85   : > { %817 = vmatpush.bf16.msrb.mxu0 %v1329_v63  ;;  %v715_v63 = vperm.slane %v712_v24, 1 }
  0x89   : > { %818 = vmatpush.bf16.msrb.mxu0 %v1321_v3 }
  0x8c   : > { %819 = vmatmul.bf16.vlgmr.msrb.gmra.mxu0 %v695_v42 }
  0xe1   : > { %v668_v4 = vpop.f32.mrf.mxu1 }
  0xe6   : > { %v686_v6 = vpop.f32.mrf.mxu2 }
  0xe7   : > { %v863_v7 = vmul.f32 %v686_v6, %v668_v4  ;;  %v827_v14 = vmul.f32 %v686_v6, %v686_v6 }
  0xe9   : > { %v670_v8 = vpop.f32.mrf.mxu1  ;;  %v650_v23 = vpop.f32.mrf.mxu0 }
  0xee   : > { %v688_v9 = vpop.f32.mrf.mxu2 }
  0xef   : > { %v864_v10 = vmul.f32 %v688_v9, %v670_v8  ;;  %v828_v13 = vmul.f32 %v688_v9, %v688_v9 }
  0xf0   : > { %v807_v26 = vpop.f32.mrf.mxu3 }
  0xf1   : > { %v866_v11 = vadd.f32 %v864_v10, %v863_v7  ;;  %v673_v12 = vpop.f32.mrf.mxu1  ;;  %v830_v16 = vadd.f32 %v828_v13, %v827_v14  ;;  %v652_v27 = vpop.f32.mrf.mxu0  ;;  %v808_v28 = vadd.f32 %v807_v26, %v714_v25 }
  0xf3   : > { %v1995_v29 = vmul.f32 %v808_v28, %v650_v23  ;;  %v1997_v30 = vmul.f32 %v808_v28, %v652_v27 }
  0xf6   : > { %v691_v15 = vpop.f32.mrf.mxu2 }
  0xf7   : > { %v829_v17 = vmul.f32 %v691_v15, %v691_v15  ;;  %v865_v18 = vmul.f32 %v691_v15, %v673_v12 }
  0xf8   : > { %v809_v31 = vpop.f32.mrf.mxu3 }
  0xf9   : > { %v831_v19 = vadd.f32 %v830_v16, %v829_v17  ;;  %v867_v20 = vadd.f32 %v866_v11, %v865_v18  ;;  %v675_v21 = vpop.f32.mrf.mxu1  ;;  %v655_v33 = vpop.f32.mrf.mxu0 }
  0xfa   : > { %v1999_v35 = vmul.f32 %v808_v28, %v655_v33 }
  0xfb   : > { %844 = vadd.xlane.f32.xlu0 %v831_v19  ;;  %1549 = vrsqrt.f32 %v831_v19  ;;  %vm839_vm0 = vcmp.eq.f32.partialorder %v831_v19, inf  ;;  %v842_v54 = vand.u32 2147483648, %v831_v19  ;;  %vm841_vm1 = vcmp.eq.f32.partialorder %v831_v19, 0.0 }
  0xfe   : > { %v693_v22 = vpop.f32.mrf.mxu2 }
 0x101   : > { %v657_v34 = vpop.f32.mrf.mxu0  ;;  %v1550_v36 = vpop.eup %1549 }
 0x102   : > { %v833_v38 = vmul.f32 %v1550_v36, %v831_v19 }
 0x104   : > { %v834_v39 = vmul.f32 %v1550_v36, %v833_v38 }
 0x106   : > { %v835_v43 = vmul.f32 0.5, %v834_v39 }
 0x108   : > { %v836_v44 = vsub.f32 1.5, %v835_v43 }
 0x109   : > { %v820_v37 = vpop.f32.mrf.mxu0 }
 0x10a   : > { %v837_v47 = vmul.f32 %v1550_v36, %v836_v44  ;;  %v821_v3 = vadd.f32 %v820_v37, %v715_v63 }
 0x10c   : > { %v838_v50 = vmul.f32 %v837_v47, %v831_v19 }
 0x10e   : > { %v840_v53 = vsel %vm839_vm0, %v831_v19, %v838_v50 }
 0x10f   : > { %v843_v57 = vsel %vm841_vm1, %v842_v54, %v840_v53 }
 0x110   : > { %v858_v60 = vadd.f32 1e-06, %v843_v57 }
 0x111   : > { %v822_v40 = vpop.f32.mrf.mxu0 }
 0x16e   : > { %v845_v42 = vpop.xlane.xlu0 %844 }
 0x16f   : > { %1551 = vrsqrt.f32 %v845_v42  ;;  %vm853_vm2 = vcmp.eq.f32.partialorder %v845_v42, inf  ;;  %v856_v56 = vand.u32 2147483648, %v845_v42  ;;  %vm855_vm3 = vcmp.eq.f32.partialorder %v845_v42, 0.0 }
 0x175   : > { %v1552_v45 = vpop.eup %1551 }
 0x176   : > { %v847_v46 = vmul.f32 %v1552_v45, %v845_v42 }
 0x178   : > { %v848_v48 = vmul.f32 %v1552_v45, %v847_v46 }
 0x17a   : > { %v849_v49 = vmul.f32 0.5, %v848_v48 }
 0x17c   : > { %v850_v51 = vsub.f32 1.5, %v849_v49 }
 0x17e   : > { %v851_v52 = vmul.f32 %v1552_v45, %v850_v51 }
 0x180   : > { %v852_v55 = vmul.f32 %v851_v52, %v845_v42 }
 0x182   : > { %v854_v58 = vsel %vm853_vm2, %v845_v42, %v852_v55 }
 0x183   : > { %v857_v59 = vsel %vm855_vm3, %v856_v56, %v854_v58 }
 0x184   : > { %v859_v61 = vadd.f32 1e-06, %v857_v59 }
 0x186   : > { %v860_v62 = vmul.f32 %v859_v61, %v858_v60 }
 0x188   : > { %1553 = vrcp.f32 %v860_v62 }
 0x18e   : > { %v1554_v0 = vpop.eup %1553 }
 0x18f   : > { %v862_v1 = vmul.f32 %v1554_v0, %v843_v57  ;;  %873 = sbr.rel (%p1378_p1) target bundleno = 618 (0x26a), region = 64 }
 0x191   : > { %v868_v4 = vmul.f32 %v867_v20, %v862_v1 }
 0x193   : > { %v2001_v6 = vadd.f32 %v868_v4, %v821_v3 }
 0x194   : > { %v1465_v7 = vld [vmem:[%s1885_s26 + $0x38] sm:$0xff]  ;;  %v1464_v8 = vld [vmem:[%s1885_s26 + $0x30] sm:$0xff]  ;;  %v1463_v9 = vld [vmem:[%s1885_s26 + $0x28] sm:$0xff]  ;;  %v874_v15 = vpack.c.bf16 %v1997_v30, %v1995_v29  ;;  %v875_v16 = vpack.c.bf16 %v1999_v35, %v1999_v35  ;;  %v997_v28 = vstv %s996_s8 }
 0x195   : > { %940 = vmatpush.bf16.msra.mxu0 %v1465_v7  ;;  %1466 = vmatpush.bf16.msra.mxu1 %v1465_v7  ;;  %v1462_v10 = vld [vmem:[%s1885_s26 + $0x20] sm:$0xff]  ;;  %v1461_v11 = vld [vmem:[%s1885_s26 + $0x18] sm:$0xff]  ;;  %v1460_v12 = vld [vmem:[%s1885_s26 + $0x10] sm:$0xff]  ;;  %v993_v27 = vmul.f32 0.2, %v2001_v6  ;;  %vm992_vm4 = vcmp.ge.f32.partialorder %v2001_v6, 0.0  ;;  %v1007_v33 = vmul.f32 %v997_v28, %v1974_v41  ;;  %v998_v54 = vmul.f32 %v997_v28, %v1944_v2 }
 0x196   : > { %v1459_v13 = vld [vmem:[%s1885_s26 + $0x8] sm:$0xff]  ;;  %v1458_v14 = vld [vmem:[%s1885_s26] sm:$0xff]  ;;  %v999_v55 = vmul.f32 %v997_v28, %v1946_v5  ;;  %v1000_v59 = vmul.f32 %v997_v28, %v1966_v32 }
 0x197   : > { %v994_v31 = vsel %vm992_vm4, %v2001_v6, %v993_v27 }
 0x198   : > { %v1008_v34 = vadd.f32 %v1007_v33, %v994_v31 }
 0x199   : > { %941 = vmatpush.bf16.msra.mxu0 %v1464_v8  ;;  %1467 = vmatpush.bf16.msra.mxu1 %v1464_v8 }
 0x19a   : > { %1009 = vst [vmem:[#allocation3] sm:$0xff] %v1008_v34 }
 0x19d   : > { %942 = vmatpush.bf16.msra.mxu0 %v1463_v9  ;;  %1468 = vmatpush.bf16.msra.mxu1 %v1463_v9 }
 0x1a1   : > { %943 = vmatpush.bf16.msra.mxu0 %v1462_v10  ;;  %1469 = vmatpush.bf16.msra.mxu1 %v1462_v10 }
 0x1a5   : > { %944 = vmatpush.bf16.msra.mxu0 %v1461_v11  ;;  %1470 = vmatpush.bf16.msra.mxu1 %v1461_v11 }
 0x1a9   : > { %945 = vmatpush.bf16.msra.mxu0 %v1460_v12  ;;  %1471 = vmatpush.bf16.msra.mxu1 %v1460_v12 }
 0x1ad   : > { %946 = vmatpush.bf16.msra.mxu0 %v1459_v13  ;;  %1472 = vmatpush.bf16.msra.mxu1 %v1459_v13 }
 0x1b1   : > { %947 = vmatpush.bf16.msra.mxu0 %v1458_v14  ;;  %1473 = vmatpush.bf16.msra.mxu1 %v1458_v14 }
 0x1b4   : > { %948 = vmatmul.bf16.vlgmr.msra.gmra.mxu0 %v874_v15  ;;  %953 = vmatmul.bf16.vlgmr.msra.gmra.mxu1 %v875_v16 }
 0x231   : > { %v949_v17 = vpop.f32.mrf.mxu0  ;;  %v954_v18 = vpop.f32.mrf.mxu1 }
 0x232   : > { %v958_v21 = vmul.f32 %v949_v17, %v949_v17  ;;  %v960_v22 = vmul.f32 %v954_v18, %v954_v18 }
 0x239   : > { %v951_v19 = vpop.f32.mrf.mxu0  ;;  %v956_v20 = vpop.f32.mrf.mxu1 }
 0x23a   : > { %v959_v23 = vmul.f32 %v951_v19, %v951_v19 }
 0x23c   : > { %v961_v24 = vadd.f32 %v959_v23, %v958_v21 }
 0x23e   : > { %v962_v25 = vadd.f32 %v961_v24, %v960_v22 }
 0x240   : > { %v963_v26 = vadd.f32 1e-12, %v962_v25 }
 0x242   : > { %1555 = vrsqrt.f32 %v963_v26  ;;  %vm970_vm6 = vweird.f32 %v963_v26 }
 0x248   : > { %v1556_v36 = vpop.eup %1555 }
 0x249   : > { %v965_v37 = vmul.f32 %v1556_v36, %v963_v26  ;;  %vm971_vm5 = vweird.f32 %v1556_v36 }
 0x24a   : > { %vm972_vm7 = vmor %vm970_vm6, %vm971_vm5 }
 0x24b   : > { %v966_v38 = vmul.f32 %v1556_v36, %v965_v37 }
 0x24d   : > { %v967_v39 = vmul.f32 0.5, %v966_v38 }
 0x24f   : > { %v968_v40 = vsub.f32 1.5, %v967_v39 }
 0x251   : > { %v969_v42 = vmul.f32 %v1556_v36, %v968_v40 }
 0x253   : > { %v973_v43 = vsel %vm972_vm7, %v1556_v36, %v969_v42 }
 0x254   : > { %v974_v44 = vmul.f32 %v973_v43, %v949_v17  ;;  %v975_v45 = vmul.f32 %v973_v43, %v951_v19  ;;  %v976_v46 = vmul.f32 %v973_v43, %v954_v18 }
 0x256   : > { %v977_v47 = vmul.f32 %v974_v44, %v1995_v29  ;;  %v978_v48 = vmul.f32 %v975_v45, %v1997_v30  ;;  %v979_v41 = vmul.f32 %v976_v46, %v1999_v35 }
 0x258   : > { %v980_v49 = vadd.f32 %v978_v48, %v977_v47 }
 0x25a   : > { %v981_v50 = vadd.f32 %v980_v49, %v979_v41 }
 0x25c   : > { %vm982_vm8 = vcmp.ge.f32.partialorder %v981_v50, 0.0  ;;  %v983_v51 = vmul.f32 0.2, %v981_v50 }
 0x25e   : > { %v984_v52 = vsel %vm982_vm8, %v981_v50, %v983_v51 }
 0x25f   : > { %v985_v53 = vsub.f32 %v984_v52, %v981_v50 }
 0x261   : > { %v986_v56 = vmul.f32 %v985_v53, %v974_v44  ;;  %v987_v57 = vmul.f32 %v985_v53, %v975_v45  ;;  %v988_v58 = vmul.f32 %v985_v53, %v976_v46 }
 0x263   : > { %v989_v60 = vadd.f32 %v986_v56, %v1995_v29  ;;  %v990_v61 = vadd.f32 %v987_v57, %v1997_v30  ;;  %v991_v62 = vadd.f32 %v988_v58, %v1999_v35 }
 0x265   : > { %v1001_v63 = vadd.f32 %v998_v54, %v989_v60  ;;  %v1002_v0 = vadd.f32 %v999_v55, %v990_v61  ;;  %v1003_v1 = vadd.f32 %v1000_v59, %v991_v62 }
 0x267   : > { %1004 = vst [vmem:[#allocation2 + $0x10] sm:$0xff] %v1001_v63 }
 0x268   : > { %1005 = vst [vmem:[#allocation2] sm:$0xff] %v1002_v0 }
 0x269   : > { %1006 = vst [vmem:[#allocation2 + $0x8] sm:$0xff] %v1003_v1 }
 0x26a PF: > { %p1411_p2 = scmp.ne.s32.totalorder %s1707_s12, 2 }
 0x26b   : > { %s2087_s12 = sld [smem:[#allocation18_spill]] (!%p1411_p2) }
 0x26c   : > { %1013 = sbr.rel (%p1411_p2) target bundleno = 629 (0x275), region = 68 }
 0x271   : > { %1014 = vst [vmem:[%s2072_s7] sm:$0xff] %v1995_v29 }
 0x272   : > { %1015 = vst [vmem:[%s2072_s7 + $0x8] sm:$0xff] %v1997_v30 }
 0x273   : > { %1016 = vst [vmem:[%s2072_s7 + $0x10] sm:$0xff] %v1999_v35 }
 0x274   : > { %1017 = vst [vmem:[%s2087_s12] sm:$0xff] %v2001_v6 }
 0x275 PF: > { %s33_s0 = sadd.s32 1, %s1715_s0   ;;  %s2088_s16 = sld [smem:[#allocation14_spill]] }
 0x276   : > { %p30_p3 = scmp.ge.s32.totalorder %s33_s0, 5   ;;  %s2089_s11 = sld [smem:[#allocation16_spill]] }
 0x277   : > { %s2090_s17 = sld [smem:[#allocation15_spill]]  ;;  %s2091_s9 = smov %s1699_s10 }
 0x278   : > { %s2093_s12 = smov %s1711_s13 }
 0x279   :  { %32 = sbr.rel (!%p30_p3) target bundleno = 13 (0xd), region = 141 }
 0x27b   : > { %s2092_s10 = smov %s2088_s16 }
 0x27d   : > { %s2094_s13 = smov %s2090_s17 }
 0x27e   :  { %1051 = vsyncpa [#allocation7], 1 }
 0x27f   :  { %1053 = vsyncpa [#allocation7 + $0x1], 1 }
 0x280   :  { %1054 = vsyncpa [#allocation9], 1 }
 0x281   :  { %1056 = vsyncpa [#allocation9 + $0x1], 1 }

</bundles_post_ra>
